<compile_context>
chip_gen: v6e
topology: v6e:2x2x1
jax: 0.10.0
libtpu: 0.0.40
codegen_flags: <defaults>
</compile_context>

<pallas_src>
import functools

import jax
import jax.numpy as jnp
from jax.experimental import pallas as pl
from jax.experimental.pallas import tpu as pltpu

_LANE = 128      # lane-dense channel padding
_HALO_OFF = 8    # aligned sublane offset of the interior rows in the padded slab


# ----------------------------------------------------------------------------
# Fused Pallas kernel (one grid step == one batch element)
# ----------------------------------------------------------------------------
def _tcnn_fused_kernel(x_ref, w1_ref, b1_ref, w2_ref, b2_ref,
                       ws_ref, bs_ref, wcf_ref, bcst_ref,
                       o_ref, pad_s):
    """Whole-network forward for one batch element.

    x_ref   : (1, L, Cp)       channels-last input, channel-padded to Cp=128
    w1_ref  : (3, Cp, Cp)      res_block conv1 (k=3)
    w2_ref  : (3, Cp, Cp)      res_block conv2 (k=3)
    ws_ref  : (Cp, Cp)         res_block 1x1 shortcut
    wcf_ref : (Cp, Cp)         folded  wc @ wf   (conv_out x fc_out)
    b*_ref  : (1, Cp)          f32 biases / folded bias constant
    o_ref   : (1, 1, Cp)       logits (first Ncls lanes valid)
    pad_s   : (L + 16, Cp) f32 VMEM slab with zero halo rows (reused by both convs)
    """
    L, Cp = x_ref.shape[1], x_ref.shape[2]
    cdt = x_ref.dtype
    OFF = _HALO_OFF

    x = x_ref[0]                                           # (L, Cp)

    # Zero-haloed slab in VMEM (replaces wrapper-side jnp.pad along L).
    # Both stores are sublane-aligned (offset 8, length L).
    pad_s[...] = jnp.zeros(pad_s.shape, pad_s.dtype)
    pad_s[pl.ds(OFF, L), :] = x.astype(pad_s.dtype)

    # --- res_block conv1: k=3, pad=1  ->  3 shifted matmuls + bias + ReLU ---
    acc = jnp.zeros((L, Cp), jnp.float32)
    for t in range(3):
        xt = pad_s[pl.ds(OFF - 1 + t, L), :].astype(cdt)
        acc = acc + jnp.dot(xt, w1_ref[t], preferred_element_type=jnp.float32)
    h1 = jnp.maximum(acc + b1_ref[...], 0.0)

    # --- res_block shortcut: 1x1 conv on the input ---
    sc = jnp.dot(x, ws_ref[...], preferred_element_type=jnp.float32) + bs_ref[...]

    # --- res_block conv2: k=3, pad=1, + bias + shortcut + ReLU (slab reused) ---
    pad_s[pl.ds(OFF, L), :] = h1.astype(pad_s.dtype)
    acc2 = sc + b2_ref[...]
    for t in range(3):
        ht = pad_s[pl.ds(OFF - 1 + t, L), :].astype(cdt)
        acc2 = acc2 + jnp.dot(ht, w2_ref[t], preferred_element_type=jnp.float32)
    h2 = jnp.maximum(acc2, 0.0)

    # --- conv_out(k=1,pad=1) + global mean pool + fc_out, algebraically fused:
    #       mean_{L+2}(h2 @ wc + bc) @ wf + bf
    #     = (sum_L h2) @ (wc @ wf) / (L+2) + (bc @ wf + bf)
    # Pooling runs on the MXU via a 1/(L+2)-filled row vector.
    pool_row = jnp.full((1, L), 1.0 / (L + 2), cdt)
    pooled = jnp.dot(pool_row, h2.astype(cdt),
                     preferred_element_type=jnp.float32)          # (1, Cp)
    logits = jnp.dot(pooled.astype(cdt), wcf_ref[...],
                     preferred_element_type=jnp.float32) + bcst_ref[...]
    o_ref[0] = logits.astype(o_ref.dtype)


# ----------------------------------------------------------------------------
# Wrapper: layout + weight padding/folding + pallas_call plumbing
# ----------------------------------------------------------------------------
def tcnn_forward(x_ncl, params, *, compute_dtype=jnp.float32, cp=_LANE):
    B, Cin, L = x_ncl.shape
    Cr = params["w1"].shape[2]
    N = params["wc"].shape[2]
    Ncls = params["wf"].shape[1]
    assert max(Cin, Cr, N, Ncls) <= cp

    f32 = jnp.float32

    def pad2(w, r, c):          # (r, c) -> (cp, cp), compute dtype (MXU operand)
        return jnp.pad(w, ((0, cp - r), (0, cp - c))).astype(compute_dtype)

    def padb(b):                # (n,) -> (1, cp), f32 (added to f32 accumulators)
        return jnp.pad(b.astype(f32), (0, cp - b.shape[0])).reshape(1, cp)

    # Zero-pad channel dims once (lane-dense layout); fold conv_out into fc_out.
    w1 = jnp.pad(params["w1"], ((0, 0), (0, cp - Cin), (0, cp - Cr))).astype(compute_dtype)
    w2 = jnp.pad(params["w2"], ((0, 0), (0, cp - Cr), (0, cp - Cr))).astype(compute_dtype)
    ws = pad2(params["ws"][0], Cin, Cr)
    wcf = pad2(params["wc"][0] @ params["wf"], Cr, Ncls)            # wc @ wf
    bcst = padb(params["bc"] @ params["wf"] + params["bf"])         # bc @ wf + bf
    b1, b2, bs = padb(params["b1"]), padb(params["b2"]), padb(params["bs"])

    # NCL -> NLC once at the boundary, channels zero-padded to 128 lanes.
    x = jnp.transpose(x_ncl, (0, 2, 1)).astype(compute_dtype)
    x = jnp.pad(x, ((0, 0), (0, 0), (0, cp - Cin)))

    out = pl.pallas_call(
        _tcnn_fused_kernel,
        out_shape=jax.ShapeDtypeStruct((B, 1, cp), jnp.float32),
        grid=(B,),
        in_specs=[
            pl.BlockSpec((1, L, cp), lambda b: (b, 0, 0)),   # x (per-batch block)
            pl.BlockSpec((3, cp, cp), lambda b: (0, 0, 0)),  # w1
            pl.BlockSpec((1, cp), lambda b: (0, 0)),         # b1
            pl.BlockSpec((3, cp, cp), lambda b: (0, 0, 0)),  # w2
            pl.BlockSpec((1, cp), lambda b: (0, 0)),         # b2
            pl.BlockSpec((cp, cp), lambda b: (0, 0)),        # ws
            pl.BlockSpec((1, cp), lambda b: (0, 0)),         # bs
            pl.BlockSpec((cp, cp), lambda b: (0, 0)),        # wc @ wf
            pl.BlockSpec((1, cp), lambda b: (0, 0)),         # bc @ wf + bf
        ],
        out_specs=pl.BlockSpec((1, 1, cp), lambda b: (b, 0, 0)),
        scratch_shapes=[pltpu.VMEM((L + 2 * _HALO_OFF, cp), jnp.float32)],
        compiler_params=pltpu.CompilerParams(
            dimension_semantics=("parallel",)),   # v7x: shard batch over 2 TCs
    )(x, w1, b1, w2, b2, ws, bs, wcf, bcst)

    return out[:, 0, :Ncls]


# ----------------------------------------------------------------------------
# Parameter init (deterministic, PyTorch-like uniform(+-1/sqrt(fan_in)))
# ----------------------------------------------------------------------------
def _uniform(key, shape, fan_in):
    bound = 1.0 / jnp.sqrt(jnp.float32(fan_in))
    return jax.random.uniform(key, shape, jnp.float32, -bound, bound)


def init_tcnn_params(key, in_channels, out_channels_res_1, out_neurons, num_classes):
    ks = jax.random.split(key, 10)
    Cin, Cr, N, Ncls = in_channels, out_channels_res_1, out_neurons, num_classes
    return {
        # res_block conv1: Conv1d(Cin, Cr, k=3, pad=1)
        "w1": _uniform(ks[0], (3, Cin, Cr), 3 * Cin),
        "b1": _uniform(ks[1], (Cr,), 3 * Cin),
        # res_block conv2: Conv1d(Cr, Cr, k=3, pad=1)
        "w2": _uniform(ks[2], (3, Cr, Cr), 3 * Cr),
        "b2": _uniform(ks[3], (Cr,), 3 * Cr),
        # res_block shortcut: Conv1d(Cin, Cr, k=1)
        "ws": _uniform(ks[4], (1, Cin, Cr), Cin),
        "bs": _uniform(ks[5], (Cr,), Cin),
        # conv_out: Conv1d(Cr, N, k=1, padding=1)
        "wc": _uniform(ks[6], (1, Cr, N), Cr),
        "bc": _uniform(ks[7], (N,), Cr),
        # fc_out: Linear(N, num_classes)
        "wf": _uniform(ks[8], (N, Ncls), N),
        "bf": _uniform(ks[9], (Ncls,), N),
    }


# ----------------------------------------------------------------------------
# Pure-JAX reference (same math as the PyTorch module, unfused)
# ----------------------------------------------------------------------------
def _ref_conv1d(x, w, b, padding, relu=False, residual=None):
    B, L, Cin = x.shape
    K, _, Cout = w.shape
    Lout = L + 2 * padding - (K - 1)
    xp = jnp.pad(x, ((0, 0), (padding, padding), (0, 0))) if padding else x
    acc = jnp.zeros((B, Lout, Cout), jnp.float32)
    for t in range(K):
        acc = acc + jnp.einsum("blc,cd->bld", xp[:, t:t + Lout, :], w[t])
    acc = acc + b.reshape(1, 1, Cout)
    if residual is not None:
        acc = acc + residual
    return jnp.maximum(acc, 0.0) if relu else acc


def _ref_forward(x_ncl, p):
    x = jnp.transpose(x_ncl, (0, 2, 1))
    h1 = _ref_conv1d(x, p["w1"], p["b1"], 1, relu=True)
    sc = _ref_conv1d(x, p["ws"], p["bs"], 0)
    h2 = _ref_conv1d(h1, p["w2"], p["b2"], 1, relu=True, residual=sc)
    h3 = _ref_conv1d(h2, p["wc"], p["bc"], 1)
    return jnp.mean(h3, axis=1) @ p["wf"] + p["bf"]


if __name__ == "__main__":
    # Small shapes consistent with the module: Conv1d -> input is (B, C, L).
    B, Cin, L = 2, 4, 16
    out_channels_res_1, out_neurons, num_classes = 8, 16, 5

    key = jax.random.PRNGKey(0)
    kx, kp = jax.random.split(key)
    x = jax.random.normal(kx, (B, Cin, L), jnp.float32)
    params = init_tcnn_params(kp, Cin, out_channels_res_1, out_neurons, num_classes)

    ref = _ref_forward(x, params)

    # f32 path: must match the unfused reference tightly.
    logits = jax.block_until_ready(jax.jit(tcnn_forward)(x, params))
    assert logits.shape == (B, num_classes)
    assert jnp.allclose(logits, ref, atol=1e-3, rtol=1e-3)

    # bf16-MXU path (v5e/v6e recommendation: bf16 inputs, f32 accumulation).
    fwd_bf16 = jax.jit(functools.partial(tcnn_forward, compute_dtype=jnp.bfloat16))
    logits_bf16 = jax.block_until_ready(fwd_bf16(x, params))
    assert logits_bf16.shape == (B, num_classes)
    assert bool(jnp.all(jnp.isfinite(logits_bf16)))
    assert jnp.allclose(logits_bf16, ref, atol=1e-1, rtol=1e-1)

    print("KERNEL_OK")
</pallas_src>

<mosaic_0001>
module attributes {stable_mosaic.version = 11 : i64} {
  func.func @_tcnn_fused_kernel(%arg0: i32, %arg1: memref<1x16x128xf32, #tpu.memory_space<vmem>>, %arg2: memref<3x128x128xf32, #tpu.memory_space<vmem>>, %arg3: memref<1x128xf32, #tpu.memory_space<vmem>>, %arg4: memref<3x128x128xf32, #tpu.memory_space<vmem>>, %arg5: memref<1x128xf32, #tpu.memory_space<vmem>>, %arg6: memref<128x128xf32, #tpu.memory_space<vmem>>, %arg7: memref<1x128xf32, #tpu.memory_space<vmem>>, %arg8: memref<128x128xf32, #tpu.memory_space<vmem>>, %arg9: memref<1x128xf32, #tpu.memory_space<vmem>>, %arg10: memref<1x1x128xf32, #tpu.memory_space<vmem>>, %arg11: memref<32x128xf32, #tpu.memory_space<vmem>>) attributes {dimension_semantics = [#tpu.dimension_semantics<parallel>], iteration_bounds = array<i64: 2>, scalar_prefetch = 0 : i64, scratch_operands = 1 : i64, tpu.core_type = #tpu.core_type<tc>, window_params = [{transform_indices = @transform_0, window_bounds = array<i64: 1, 16, 128>}, {pipeline_mode = #tpu.pipeline_mode<synchronous>, transform_indices = @transform_1, window_bounds = array<i64: 3, 128, 128>}, {pipeline_mode = #tpu.pipeline_mode<synchronous>, transform_indices = @transform_2, window_bounds = array<i64: 1, 128>}, {pipeline_mode = #tpu.pipeline_mode<synchronous>, transform_indices = @transform_3, window_bounds = array<i64: 3, 128, 128>}, {pipeline_mode = #tpu.pipeline_mode<synchronous>, transform_indices = @transform_4, window_bounds = array<i64: 1, 128>}, {pipeline_mode = #tpu.pipeline_mode<synchronous>, transform_indices = @transform_5, window_bounds = array<i64: 128, 128>}, {pipeline_mode = #tpu.pipeline_mode<synchronous>, transform_indices = @transform_6, window_bounds = array<i64: 1, 128>}, {pipeline_mode = #tpu.pipeline_mode<synchronous>, transform_indices = @transform_7, window_bounds = array<i64: 128, 128>}, {pipeline_mode = #tpu.pipeline_mode<synchronous>, transform_indices = @transform_8, window_bounds = array<i64: 1, 128>}, {transform_indices = @transform_9, window_bounds = array<i64: 1, 1, 128>}]} {
    %c0 = arith.constant 0 : index
    %c0_0 = arith.constant 0 : index
    %c0_1 = arith.constant 0 : index
    %0 = vector.load %arg1[%c0, %c0_0, %c0_1] : memref<1x16x128xf32, #tpu.memory_space<vmem>>, vector<1x16x128xf32>
    %1 = vector.shape_cast %0 : vector<1x16x128xf32> to vector<16x128xf32>
    %cst = arith.constant 0.000000e+00 : f32
    %2 = vector.broadcast %cst : f32 to vector<32x128xf32>
    %c0_2 = arith.constant 0 : index
    %c0_3 = arith.constant 0 : index
    %3 = vector.load %arg11[%c0_2, %c0_3] : memref<32x128xf32, #tpu.memory_space<vmem>>, vector<32x128xf32>
    tpu.vector_store %arg11[%c0_2, %c0_3], %2 {strides = array<i32>} : memref<32x128xf32, #tpu.memory_space<vmem>>, vector<32x128xf32>,
    %c8 = arith.constant 8 : index
    %c0_4 = arith.constant 0 : index
    %4 = vector.load %arg11[%c8, %c0_4] : memref<32x128xf32, #tpu.memory_space<vmem>>, vector<16x128xf32>
    tpu.vector_store %arg11[%c8, %c0_4], %1 {strides = array<i32>} : memref<32x128xf32, #tpu.memory_space<vmem>>, vector<16x128xf32>,
    %cst_5 = arith.constant 0.000000e+00 : f32
    %5 = vector.broadcast %cst_5 : f32 to vector<16x128xf32>
    %c7 = arith.constant 7 : index
    %c0_6 = arith.constant 0 : index
    %6 = vector.load %arg11[%c7, %c0_6] : memref<32x128xf32, #tpu.memory_space<vmem>>, vector<16x128xf32>
    %c0_7 = arith.constant 0 : index
    %c0_8 = arith.constant 0 : index
    %c0_9 = arith.constant 0 : index
    %7 = vector.load %arg2[%c0_7, %c0_8, %c0_9] : memref<3x128x128xf32, #tpu.memory_space<vmem>>, vector<1x128x128xf32>
    %8 = vector.shape_cast %7 : vector<1x128x128xf32> to vector<128x128xf32>
    %cst_10 = arith.constant dense<0.000000e+00> : vector<16x128xf32>
    %9 = tpu.matmul %6, %8, %cst_10 {dimension_numbers = #tpu.dot_dimension_numbers<[1], [0], [0], [1], [0, 0, 1, 1], [], []>} : vector<16x128xf32>, vector<128x128xf32>, vector<16x128xf32> -> vector<16x128xf32>
    %10 = arith.addf %5, %9 : vector<16x128xf32>
    %c8_11 = arith.constant 8 : index
    %c0_12 = arith.constant 0 : index
    %11 = vector.load %arg11[%c8_11, %c0_12] : memref<32x128xf32, #tpu.memory_space<vmem>>, vector<16x128xf32>
    %c1 = arith.constant 1 : index
    %c0_13 = arith.constant 0 : index
    %c0_14 = arith.constant 0 : index
    %12 = vector.load %arg2[%c1, %c0_13, %c0_14] : memref<3x128x128xf32, #tpu.memory_space<vmem>>, vector<1x128x128xf32>
    %13 = vector.shape_cast %12 : vector<1x128x128xf32> to vector<128x128xf32>
    %cst_15 = arith.constant dense<0.000000e+00> : vector<16x128xf32>
    %14 = tpu.matmul %11, %13, %cst_15 {dimension_numbers = #tpu.dot_dimension_numbers<[1], [0], [0], [1], [0, 0, 1, 1], [], []>} : vector<16x128xf32>, vector<128x128xf32>, vector<16x128xf32> -> vector<16x128xf32>
    %15 = arith.addf %10, %14 : vector<16x128xf32>
    %c9 = arith.constant 9 : index
    %c0_16 = arith.constant 0 : index
    %16 = vector.load %arg11[%c9, %c0_16] : memref<32x128xf32, #tpu.memory_space<vmem>>, vector<16x128xf32>
    %c2 = arith.constant 2 : index
    %c0_17 = arith.constant 0 : index
    %c0_18 = arith.constant 0 : index
    %17 = vector.load %arg2[%c2, %c0_17, %c0_18] : memref<3x128x128xf32, #tpu.memory_space<vmem>>, vector<1x128x128xf32>
    %18 = vector.shape_cast %17 : vector<1x128x128xf32> to vector<128x128xf32>
    %cst_19 = arith.constant dense<0.000000e+00> : vector<16x128xf32>
    %19 = tpu.matmul %16, %18, %cst_19 {dimension_numbers = #tpu.dot_dimension_numbers<[1], [0], [0], [1], [0, 0, 1, 1], [], []>} : vector<16x128xf32>, vector<128x128xf32>, vector<16x128xf32> -> vector<16x128xf32>
    %20 = arith.addf %15, %19 : vector<16x128xf32>
    %c0_20 = arith.constant 0 : index
    %c0_21 = arith.constant 0 : index
    %21 = vector.load %arg3[%c0_20, %c0_21] : memref<1x128xf32, #tpu.memory_space<vmem>>, vector<1x128xf32>
    %22 = vector.broadcast %21 : vector<1x128xf32> to vector<16x128xf32>
    %23 = arith.addf %20, %22 : vector<16x128xf32>
    %cst_22 = arith.constant 0.000000e+00 : f32
    %24 = vector.broadcast %cst_22 : f32 to vector<16x128xf32>
    %25 = arith.maximumf %23, %24 : vector<16x128xf32>
    %c0_23 = arith.constant 0 : index
    %c0_24 = arith.constant 0 : index
    %26 = vector.load %arg6[%c0_23, %c0_24] : memref<128x128xf32, #tpu.memory_space<vmem>>, vector<128x128xf32>
    %cst_25 = arith.constant dense<0.000000e+00> : vector<16x128xf32>
    %27 = tpu.matmul %1, %26, %cst_25 {dimension_numbers = #tpu.dot_dimension_numbers<[1], [0], [0], [1], [0, 0, 1, 1], [], []>} : vector<16x128xf32>, vector<128x128xf32>, vector<16x128xf32> -> vector<16x128xf32>
    %c0_26 = arith.constant 0 : index
    %c0_27 = arith.constant 0 : index
    %28 = vector.load %arg7[%c0_26, %c0_27] : memref<1x128xf32, #tpu.memory_space<vmem>>, vector<1x128xf32>
    %29 = vector.broadcast %28 : vector<1x128xf32> to vector<16x128xf32>
    %30 = arith.addf %27, %29 : vector<16x128xf32>
    %c8_28 = arith.constant 8 : index
    %c0_29 = arith.constant 0 : index
    %31 = vector.load %arg11[%c8_28, %c0_29] : memref<32x128xf32, #tpu.memory_space<vmem>>, vector<16x128xf32>
    tpu.vector_store %arg11[%c8_28, %c0_29], %25 {strides = array<i32>} : memref<32x128xf32, #tpu.memory_space<vmem>>, vector<16x128xf32>,
    %c0_30 = arith.constant 0 : index
    %c0_31 = arith.constant 0 : index
    %32 = vector.load %arg5[%c0_30, %c0_31] : memref<1x128xf32, #tpu.memory_space<vmem>>, vector<1x128xf32>
    %33 = vector.broadcast %32 : vector<1x128xf32> to vector<16x128xf32>
    %34 = arith.addf %30, %33 : vector<16x128xf32>
    %c7_32 = arith.constant 7 : index
    %c0_33 = arith.constant 0 : index
    %35 = vector.load %arg11[%c7_32, %c0_33] : memref<32x128xf32, #tpu.memory_space<vmem>>, vector<16x128xf32>
    %c0_34 = arith.constant 0 : index
    %c0_35 = arith.constant 0 : index
    %c0_36 = arith.constant 0 : index
    %36 = vector.load %arg4[%c0_34, %c0_35, %c0_36] : memref<3x128x128xf32, #tpu.memory_space<vmem>>, vector<1x128x128xf32>
    %37 = vector.shape_cast %36 : vector<1x128x128xf32> to vector<128x128xf32>
    %cst_37 = arith.constant dense<0.000000e+00> : vector<16x128xf32>
    %38 = tpu.matmul %35, %37, %cst_37 {dimension_numbers = #tpu.dot_dimension_numbers<[1], [0], [0], [1], [0, 0, 1, 1], [], []>} : vector<16x128xf32>, vector<128x128xf32>, vector<16x128xf32> -> vector<16x128xf32>
    %39 = arith.addf %34, %38 : vector<16x128xf32>
    %c8_38 = arith.constant 8 : index
    %c0_39 = arith.constant 0 : index
    %40 = vector.load %arg11[%c8_38, %c0_39] : memref<32x128xf32, #tpu.memory_space<vmem>>, vector<16x128xf32>
    %c1_40 = arith.constant 1 : index
    %c0_41 = arith.constant 0 : index
    %c0_42 = arith.constant 0 : index
    %41 = vector.load %arg4[%c1_40, %c0_41, %c0_42] : memref<3x128x128xf32, #tpu.memory_space<vmem>>, vector<1x128x128xf32>
    %42 = vector.shape_cast %41 : vector<1x128x128xf32> to vector<128x128xf32>
    %cst_43 = arith.constant dense<0.000000e+00> : vector<16x128xf32>
    %43 = tpu.matmul %40, %42, %cst_43 {dimension_numbers = #tpu.dot_dimension_numbers<[1], [0], [0], [1], [0, 0, 1, 1], [], []>} : vector<16x128xf32>, vector<128x128xf32>, vector<16x128xf32> -> vector<16x128xf32>
    %44 = arith.addf %39, %43 : vector<16x128xf32>
    %c9_44 = arith.constant 9 : index
    %c0_45 = arith.constant 0 : index
    %45 = vector.load %arg11[%c9_44, %c0_45] : memref<32x128xf32, #tpu.memory_space<vmem>>, vector<16x128xf32>
    %c2_46 = arith.constant 2 : index
    %c0_47 = arith.constant 0 : index
    %c0_48 = arith.constant 0 : index
    %46 = vector.load %arg4[%c2_46, %c0_47, %c0_48] : memref<3x128x128xf32, #tpu.memory_space<vmem>>, vector<1x128x128xf32>
    %47 = vector.shape_cast %46 : vector<1x128x128xf32> to vector<128x128xf32>
    %cst_49 = arith.constant dense<0.000000e+00> : vector<16x128xf32>
    %48 = tpu.matmul %45, %47, %cst_49 {dimension_numbers = #tpu.dot_dimension_numbers<[1], [0], [0], [1], [0, 0, 1, 1], [], []>} : vector<16x128xf32>, vector<128x128xf32>, vector<16x128xf32> -> vector<16x128xf32>
    %49 = arith.addf %44, %48 : vector<16x128xf32>
    %cst_50 = arith.constant 0.000000e+00 : f32
    %50 = vector.broadcast %cst_50 : f32 to vector<16x128xf32>
    %51 = arith.maximumf %49, %50 : vector<16x128xf32>
    %cst_51 = arith.constant 0.055555556 : f32
    %52 = vector.broadcast %cst_51 : f32 to vector<1x16xf32>
    %cst_52 = arith.constant dense<0.000000e+00> : vector<1x128xf32>
    %53 = tpu.matmul %52, %51, %cst_52 {dimension_numbers = #tpu.dot_dimension_numbers<[1], [0], [0], [1], [0, 0, 1, 1], [], []>} : vector<1x16xf32>, vector<16x128xf32>, vector<1x128xf32> -> vector<1x128xf32>
    %c0_53 = arith.constant 0 : index
    %c0_54 = arith.constant 0 : index
    %54 = vector.load %arg8[%c0_53, %c0_54] : memref<128x128xf32, #tpu.memory_space<vmem>>, vector<128x128xf32>
    %cst_55 = arith.constant dense<0.000000e+00> : vector<1x128xf32>
    %55 = tpu.matmul %53, %54, %cst_55 {dimension_numbers = #tpu.dot_dimension_numbers<[1], [0], [0], [1], [0, 0, 1, 1], [], []>} : vector<1x128xf32>, vector<128x128xf32>, vector<1x128xf32> -> vector<1x128xf32>
    %c0_56 = arith.constant 0 : index
    %c0_57 = arith.constant 0 : index
    %56 = vector.load %arg9[%c0_56, %c0_57] : memref<1x128xf32, #tpu.memory_space<vmem>>, vector<1x128xf32>
    %57 = arith.addf %55, %56 : vector<1x128xf32>
    %c0_58 = arith.constant 0 : index
    %c0_59 = arith.constant 0 : index
    %c0_60 = arith.constant 0 : index
    %58 = vector.load %arg10[%c0_58, %c0_59, %c0_60] : memref<1x1x128xf32, #tpu.memory_space<vmem>>, vector<1x1x128xf32>
    %59 = vector.shape_cast %58 : vector<1x1x128xf32> to vector<1x128xf32>
    %60 = vector.shape_cast %57 : vector<1x128xf32> to vector<1x1x128xf32>
    tpu.vector_store %arg10[%c0_58, %c0_59, %c0_60], %60 {strides = array<i32>} : memref<1x1x128xf32, #tpu.memory_space<vmem>>, vector<1x1x128xf32>,
    return
  }
  func.func @transform_0(%arg0: i32) -> (i32, i32, i32) {
    %c0_i32 = arith.constant 0 : i32
    %c0_i32_0 = arith.constant 0 : i32
    %c0_i32_1 = arith.constant 0 : i32
    return %arg0, %c0_i32, %c0_i32_0 : i32, i32, i32
  }
  func.func @transform_1(%arg0: i32) -> (i32, i32, i32) {
    %c0_i32 = arith.constant 0 : i32
    %c0_i32_0 = arith.constant 0 : i32
    %c0_i32_1 = arith.constant 0 : i32
    %c0_i32_2 = arith.constant 0 : i32
    return %c0_i32, %c0_i32_0, %c0_i32_1 : i32, i32, i32
  }
  func.func @transform_2(%arg0: i32) -> (i32, i32) {
    %c0_i32 = arith.constant 0 : i32
    %c0_i32_0 = arith.constant 0 : i32
    %c0_i32_1 = arith.constant 0 : i32
    return %c0_i32, %c0_i32_0 : i32, i32
  }
  func.func @transform_3(%arg0: i32) -> (i32, i32, i32) {
    %c0_i32 = arith.constant 0 : i32
    %c0_i32_0 = arith.constant 0 : i32
    %c0_i32_1 = arith.constant 0 : i32
    %c0_i32_2 = arith.constant 0 : i32
    return %c0_i32, %c0_i32_0, %c0_i32_1 : i32, i32, i32
  }
  func.func @transform_4(%arg0: i32) -> (i32, i32) {
    %c0_i32 = arith.constant 0 : i32
    %c0_i32_0 = arith.constant 0 : i32
    %c0_i32_1 = arith.constant 0 : i32
    return %c0_i32, %c0_i32_0 : i32, i32
  }
  func.func @transform_5(%arg0: i32) -> (i32, i32) {
    %c0_i32 = arith.constant 0 : i32
    %c0_i32_0 = arith.constant 0 : i32
    %c0_i32_1 = arith.constant 0 : i32
    return %c0_i32, %c0_i32_0 : i32, i32
  }
  func.func @transform_6(%arg0: i32) -> (i32, i32) {
    %c0_i32 = arith.constant 0 : i32
    %c0_i32_0 = arith.constant 0 : i32
    %c0_i32_1 = arith.constant 0 : i32
    return %c0_i32, %c0_i32_0 : i32, i32
  }
  func.func @transform_7(%arg0: i32) -> (i32, i32) {
    %c0_i32 = arith.constant 0 : i32
    %c0_i32_0 = arith.constant 0 : i32
    %c0_i32_1 = arith.constant 0 : i32
    return %c0_i32, %c0_i32_0 : i32, i32
  }
  func.func @transform_8(%arg0: i32) -> (i32, i32) {
    %c0_i32 = arith.constant 0 : i32
    %c0_i32_0 = arith.constant 0 : i32
    %c0_i32_1 = arith.constant 0 : i32
    return %c0_i32, %c0_i32_0 : i32, i32
  }
  func.func @transform_9(%arg0: i32) -> (i32, i32, i32) {
    %c0_i32 = arith.constant 0 : i32
    %c0_i32_0 = arith.constant 0 : i32
    %c0_i32_1 = arith.constant 0 : i32
    return %arg0, %c0_i32, %c0_i32_0 : i32, i32, i32
  }
}

</mosaic_0001>

<bundles_post_ra>
// kernel: tcnn_forward.1
= control target key start
LH: loop header
LB: loop body
LE: loop exit
PB: predicated region body
PF: predicated region fallthrough
CT: control target
= control target key end

     0   :  { %14 = vsyncpa [#allocation4], 0  ;;  %s2452_s0 = inlined_call_operand.vmem [shape: f32[2,16,128], index: 0, kind: input, shape index: {}]   ;;  %s2453_s1 = inlined_call_operand.vmem [shape: f32[3,128,128], index: 1, kind: input, shape index: {}]   ;;  %s2454_s2 = inlined_call_operand.vmem [shape: f32[1,128], index: 2, kind: input, shape index: {}]   ;;  %s2455_s3 = inlined_call_operand.vmem [shape: f32[3,128,128], index: 3, kind: input, shape index: {}]   ;;  %s2456_s4 = inlined_call_operand.vmem [shape: f32[1,128], index: 4, kind: input, shape index: {}]   ;;  %s2457_s5 = inlined_call_operand.vmem [shape: f32[128,128], index: 5, kind: input, shape index: {}]   ;;  %s2458_s6 = inlined_call_operand.vmem [shape: f32[1,128], index: 6, kind: input, shape index: {}]   ;;  %s2459_s7 = inlined_call_operand.vmem [shape: f32[128,128], index: 7, kind: input, shape index: {}]   ;;  %s2460_s8 = inlined_call_operand.vmem [shape: f32[1,128], index: 8, kind: input, shape index: {}]   ;;  %s2461_s9 = inlined_call_operand.hbm [shape: f32[2,1,128], index: 9, kind: output, shape index: {}]  }
   0x1   :  { %16 = vsyncpa [#allocation4 + $0x1], 0  ;;  %s1929_s30 = smov 0   ;;  %s1931_s10 = smov 0  }
   0x2   :  { %s1933_s11 = smov 0   ;;  %s1935_s12 = smov 0  }
   0x3 LB: > { %s1950_s13 = sadd.s32 4294967295, %s1873_s12   ;;  %s1260_s14 = sadd.s32 4294967294, %s1873_s12   ;;  %s1873_s12 = sphi %s1935_s12, %s2467_s12   ;;  %s1869_s11 = sphi %s1933_s11, %s2466_s11   ;;  %s1865_s10 = sphi %s1931_s10, %s2465_s10   ;;  %s1861_s30 = sphi %s1929_s30, %s2464_s30  }
   0x4   : > { %s1954_s15 = sadd.s32 1, %s1873_s12   ;;  %s223_s16 = sadd.s32 1, %s1869_s11 }
   0x5   : > { %s220_s17 = ssub.s32 %s1873_s12, %s1954_s15  ;;  %p233_p0 = scmp.ne.s32.totalorder %s1869_s11, %s1865_s10 }
   0x6   : > { %p221_p1 = scmp.eq.s32.totalorder %s220_s17, 0  ;;  %p234_p2 = scmp.eq.s32.totalorder %s1950_s13, 1 }
   0x7   : > { %p239_p3 = scmp.ne.s32.totalorder %s1865_s10, %s1861_s30  ;;  %p240_p4 = scmp.eq.s32.totalorder %s1260_s14, 1 }
   0x8   : > { %s1965_s18 = scalar_select %p221_p1, %s1869_s11, %s223_s16  }
   0x9   : > { %p1967_p5 = por %p234_p2, %p233_p0  ;;  %p1971_p6 = por %p240_p4, %p239_p3 }
   0xa   : > { %p1263_p7 = scmp.ge.s32.totalorder %s1873_s12, 1  ;;  %p290_p8 = scmp.lt.s32.totalorder %s1873_s12, 3 }
   0xc   : > { %p291_p9 = pnand %p1263_p7, %p290_p8 }
   0xd   : > { %p325_p10 = scmp.lt.s32.totalorder (!%p291_p9), %s1950_s13, 1  ;;  %s1334_s28 = sshll.u32 (!%p291_p9), %s1950_s13, 4 }
   0xe   : > { %294 = sbr.rel (%p291_p9) target bundleno = 929 (0x3a1), region = 56  ;;  %s2417_s17 = scalar_lea.hbm (!%p291_p9), %s2461_s9, %s1334_s28 }
   0xf   : > { %s1878_s24 = smov (!%p291_p9), [#allocation3]  }
  0x13   : > { %v1281_v0 = vld [vmem:[%s2453_s1 + $0xf8] sm:$0xff]  ;;  %v1280_v2 = vld [vmem:[%s2453_s1 + $0xf0] sm:$0xff]  ;;  %v1875_v4 = vmov 0.0   ;;  %v1279_v5 = vld [vmem:[%s2453_s1 + $0xe8] sm:$0xff]  ;;  %s326_s21 = scalar_select %p325_p10, %s1950_s13, 1  ;;  %vm1876_vm0 = vmmov 0  }
  0x14   : > { %v355_v1 = vld [vmem:[%s2453_s1 + $0x78] sm:$0xff]  ;;  %1484 = vmatprep.subr.mxu0 %v1281_v0  ;;  %v354_v3 = vld [vmem:[%s2453_s1 + $0x70] sm:$0xff]  ;;  %332 = vst [vmem:[#allocation2] sm:$0xff] %v1875_v4  ;;  %335 = vst [vmem:[#allocation2 + $0x18] sm:$0xff] %v1875_v4  ;;  %vm1030_vm1 = vcmask 130048   ;;  %s1817_s13 = sshll.u32 %s1878_s24, 4  ;;  %s1818_s13 = int_to_ptr.vmem [resolvable:$false] %s1817_s13 }
  0x15   : > { %1519 = vmatprep.subr.mxu1 %v355_v1  ;;  %1485 = vmatpush3.msra.mxu0 %v1281_v0  ;;  %v353_v6 = vld [vmem:[%s2453_s1 + $0x68] sm:$0xff]  ;;  %v1278_v7 = vld [vmem:[%s2453_s1 + $0xe0] sm:$0xff]  ;;  %s1337_s26 = sshll.u32 %s326_s21, 4  ;;  %v1277_v9 = vld [vmem:[%s2453_s1 + $0xd8] sm:$0xff]  ;;  %s1819_s25 = scalar_lea.vmem %s1818_s13, 32 }
  0x16   : > { %1520 = vmatpush3.msra.mxu1 %v355_v1  ;;  %1486 = vmatprep.subr.mxu0 %v1280_v2  ;;  %v352_v8 = vld [vmem:[%s2453_s1 + $0x60] sm:$0xff]  ;;  %v351_v10 = vld [vmem:[%s2453_s1 + $0x58] sm:$0xff]  ;;  %s329_s22 = scalar_lea.vmem %s2452_s0, %s1337_s26  ;;  %v1276_v11 = vld [vmem:[%s2453_s1 + $0xd0] sm:$0xff] }
  0x17   : > { %1521 = vmatprep.subr.mxu1 %v354_v3  ;;  %1487 = vmatpush3.msra.mxu0 %v1280_v2  ;;  %v350_v12 = vld [vmem:[%s2453_s1 + $0x50] sm:$0xff]  ;;  %v1275_v13 = vld [vmem:[%s2453_s1 + $0xc8] sm:$0xff]  ;;  %v2026_v15 = vld [vmem:[%s329_s22] sm:$0xff] }
  0x18   : > { %1522 = vmatpush3.msra.mxu1 %v354_v3  ;;  %1488 = vmatprep.subr.mxu0 %v1279_v5  ;;  %v349_v14 = vld [vmem:[%s2453_s1 + $0x48] sm:$0xff]  ;;  %336 = vst [vmem:[#allocation2 + $0x8] sm:$0xff] %v2026_v15  ;;  %v1274_v17 = vld [vmem:[%s2453_s1 + $0xc0] sm:$0xff]  ;;  %v1273_v19 = vld [vmem:[%s2453_s1 + $0xb8] sm:$0xff] }
  0x19   : > { %1523 = vmatprep.subr.mxu1 %v353_v6  ;;  %1489 = vmatpush3.msra.mxu0 %v1279_v5  ;;  %v2029_v16 = vld [vmem:[%s329_s22 + $0x8] sm:$0xff]  ;;  %v348_v18 = vld [vmem:[%s2453_s1 + $0x40] sm:$0xff]  ;;  %v347_v20 = vld [vmem:[%s2453_s1 + $0x38] sm:$0xff]  ;;  %s323_s22 = sand.u32 1, %s1865_s10  }
  0x1a   : > { %1524 = vmatpush3.msra.mxu1 %v353_v6  ;;  %1490 = vmatprep.subr.mxu0 %v1278_v7  ;;  %337 = vst [vmem:[#allocation2 + $0x10] sm:$0xff] %v2029_v16  ;;  %v1272_v21 = vld [vmem:[%s2453_s1 + $0xb0] sm:$0xff]  ;;  %v1271_v23 = vld [vmem:[%s2453_s1 + $0xa8] sm:$0xff]  ;;  %v1270_v25 = vld [vmem:[%s2453_s1 + $0xa0] sm:$0xff]  ;;  %s324_s29 = scalar_lea.vmem [#allocation3], %s323_s22  ;;  %s1193_s21 = scalar_lea.sflag [#allocation4], %s323_s22 }
  0x1b   : > { %1525 = vmatprep.subr.mxu1 %v352_v8  ;;  %1491 = vmatpush3.msra.mxu0 %v1278_v7  ;;  %v346_v22 = vld [vmem:[%s2453_s1 + $0x30] sm:$0xff]  ;;  %v345_v24 = vld [vmem:[%s2453_s1 + $0x28] sm:$0xff]  ;;  %v344_v26 = vld [vmem:[%s2453_s1 + $0x20] sm:$0xff]  ;;  %s1205_s26 = sshll.u32 %s324_s29, 4  ;;  %s1206_s26 = int_to_ptr.vmem [resolvable:$true] %s1205_s26 }
  0x1c   : > { %1526 = vmatpush3.msra.mxu1 %v352_v8  ;;  %1492 = vmatprep.subr.mxu0 %v1277_v9  ;;  %v1269_v27 = vld [vmem:[%s2453_s1 + $0x98] sm:$0xff]  ;;  %v1268_v29 = vld [vmem:[%s2453_s1 + $0x90] sm:$0xff]  ;;  %v1267_v31 = vld [vmem:[%s2453_s1 + $0x88] sm:$0xff]  ;;  %s1813_s23 = scalar_lea.vmem %s1206_s26, 16  ;;  %p1820_p0 = scmp.lt.s32.totalorder %s1206_s26, %s1818_s13 }
  0x1d   : > { %1527 = vmatprep.subr.mxu1 %v351_v10  ;;  %1493 = vmatpush3.msra.mxu0 %v1277_v9  ;;  %v343_v28 = vld [vmem:[%s2453_s1 + $0x18] sm:$0xff]  ;;  %v342_v30 = vld [vmem:[%s2453_s1 + $0x10] sm:$0xff]  ;;  %v341_v32 = vld [vmem:[%s2453_s1 + $0x8] sm:$0xff]  ;;  %p1814_p11 = scmp.ne.s32.totalorder %s1206_s26, %s1813_s23  ;;  %p1821_p1 = scmp.lt.s32.totalorder %s1819_s25, %s1813_s23 }
  0x1e   : > { %1528 = vmatpush3.msra.mxu1 %v351_v10  ;;  %1494 = vmatprep.subr.mxu0 %v1276_v11  ;;  %v1266_v33 = vld [vmem:[%s2453_s1 + $0x80] sm:$0xff]  ;;  %v1297_v37 = vld [vmem:[%s2453_s1 + $0x178] sm:$0xff]  ;;  %v1296_v40 = vld [vmem:[%s2453_s1 + $0x170] sm:$0xff] }
  0x1f   : > { %1529 = vmatprep.subr.mxu1 %v350_v12  ;;  %1495 = vmatpush3.msra.mxu0 %v1276_v11  ;;  %v340_v34 = vld [vmem:[%s2453_s1] sm:$0xff]  ;;  %v647_v39 = vld [vmem:[%s2457_s5 + $0x78] sm:$0xff]  ;;  %v646_v41 = vld [vmem:[%s2457_s5 + $0x70] sm:$0xff]  ;;  %p1815_p12 = pnand %p1814_p11, %p1967_p5  ;;  %p1822_p2 = por %p1821_p1, %p1820_p0 }
  0x20   : > { %1530 = vmatpush3.msra.mxu1 %v350_v12  ;;  %1496 = vmatprep.subr.mxu0 %v1275_v13  ;;  %v338_v35 = vld [vmem:[#allocation2 + $0x7] sm:$0xff]  ;;  %v1293_v46 = vld [vmem:[%s2453_s1 + $0x158] sm:$0xff]  ;;  %v1292_v48 = vld [vmem:[%s2453_s1 + $0x150] sm:$0xff] }
  0x21   : > { %1531 = vmatprep.subr.mxu1 %v349_v14  ;;  %1497 = vmatpush3.msra.mxu0 %v1275_v13  ;;  %v339_v36 = vld [vmem:[#allocation2 + $0xf] sm:$0xff]  ;;  %v1294_v44 = vld [vmem:[%s2453_s1 + $0x160] sm:$0xff]  ;;  %v643_v47 = vld [vmem:[%s2457_s5 + $0x58] sm:$0xff]  ;;  %p1816_p13 = pneg %p1815_p12 }
  0x22   : > { %1532 = vmatpush3.msra.mxu1 %v349_v14  ;;  %1498 = vmatprep.subr.mxu0 %v1274_v17  ;;  %v525_v38 = vld [vmem:[#allocation2 + $0x9] sm:$0xff]  ;;  %v644_v45 = vld [vmem:[%s2457_s5 + $0x60] sm:$0xff]  ;;  %v1289_v53 = vld [vmem:[%s2453_s1 + $0x138] sm:$0xff] }
  0x23   : > { %1533 = vmatprep.subr.mxu1 %v348_v18  ;;  %1499 = vmatpush3.msra.mxu0 %v1274_v17  ;;  %v1295_v42 = vld [vmem:[%s2453_s1 + $0x168] sm:$0xff]  ;;  %v642_v49 = vld [vmem:[%s2457_s5 + $0x50] sm:$0xff]  ;;  %v1290_v52 = vld [vmem:[%s2453_s1 + $0x140] sm:$0xff]  ;;  %p1823_p3 = pnand %p1822_p2, %p1816_p13 }
  0x24   : > { %1534 = vmatpush3.msra.mxu1 %v348_v18  ;;  %1500 = vmatprep.subr.mxu0 %v1273_v19  ;;  %v645_v43 = vld [vmem:[%s2457_s5 + $0x68] sm:$0xff]  ;;  %v1288_v54 = vld [vmem:[%s2453_s1 + $0x130] sm:$0xff]  ;;  %v1286_v56 = vld [vmem:[%s2453_s1 + $0x120] sm:$0xff] }
  0x25   : > { %1535 = vmatprep.subr.mxu1 %v347_v20  ;;  %1501 = vmatpush3.msra.mxu0 %v1273_v19  ;;  %v1291_v50 = vld [vmem:[%s2453_s1 + $0x148] sm:$0xff]  ;;  %v1285_v57 = vld [vmem:[%s2453_s1 + $0x118] sm:$0xff]  ;;  %v1284_v58 = vld [vmem:[%s2453_s1 + $0x110] sm:$0xff] }
  0x26   : > { %1536 = vmatpush3.msra.mxu1 %v347_v20  ;;  %1502 = vmatprep.subr.mxu0 %v1272_v21  ;;  %v641_v51 = vld [vmem:[%s2457_s5 + $0x48] sm:$0xff]  ;;  %v1282_v60 = vld [vmem:[%s2453_s1 + $0x100] sm:$0xff]  ;;  %v526_v61 = vld [vmem:[#allocation2 + $0x11] sm:$0xff] }
  0x27   : > { %1537 = vmatprep.subr.mxu1 %v346_v22  ;;  %1503 = vmatpush3.msra.mxu0 %v1272_v21  ;;  %v1287_v55 = vld [vmem:[%s2453_s1 + $0x128] sm:$0xff]  ;;  %v640_v62 = vld [vmem:[%s2457_s5 + $0x40] sm:$0xff]  ;;  %v639_v63 = vld [vmem:[%s2457_s5 + $0x38] sm:$0xff] }
  0x28   : > { %1538 = vmatpush3.msra.mxu1 %v346_v22  ;;  %1504 = vmatprep.subr.mxu0 %v1271_v23  ;;  %v1283_v59 = vld [vmem:[%s2453_s1 + $0x108] sm:$0xff]  ;;  %v638_v0 = vld [vmem:[%s2457_s5 + $0x30] sm:$0xff]  ;;  %v636_v2 = vld [vmem:[%s2457_s5 + $0x20] sm:$0xff] }
  0x29   : > { %1539 = vmatprep.subr.mxu1 %v345_v24  ;;  %1505 = vmatpush3.msra.mxu0 %v1271_v23  ;;  %v637_v1 = vld [vmem:[%s2457_s5 + $0x28] sm:$0xff]  ;;  %v635_v3 = vld [vmem:[%s2457_s5 + $0x18] sm:$0xff]  ;;  %v634_v5 = vld [vmem:[%s2457_s5 + $0x10] sm:$0xff] }
  0x2a   : > { %1540 = vmatpush3.msra.mxu1 %v345_v24  ;;  %1506 = vmatprep.subr.mxu0 %v1270_v25  ;;  %v633_v6 = vld [vmem:[%s2457_s5 + $0x8] sm:$0xff]  ;;  %v758_v7 = vld [vmem:[%s2455_s3 + $0x78] sm:$0xff]  ;;  %v757_v8 = vld [vmem:[%s2455_s3 + $0x70] sm:$0xff] }
  0x2b   : > { %1541 = vmatprep.subr.mxu1 %v344_v26  ;;  %1507 = vmatpush3.msra.mxu0 %v1270_v25  ;;  %v632_v9 = vld [vmem:[%s2457_s5] sm:$0xff]  ;;  %v756_v10 = vld [vmem:[%s2455_s3 + $0x68] sm:$0xff]  ;;  %v1316_v11 = vld [vmem:[%s2455_s3 + $0xf8] sm:$0xff] }
  0x2c   : > { %1542 = vmatpush3.msra.mxu1 %v344_v26  ;;  %1508 = vmatprep.subr.mxu0 %v1269_v27  ;;  %v755_v12 = vld [vmem:[%s2455_s3 + $0x60] sm:$0xff]  ;;  %v1315_v13 = vld [vmem:[%s2455_s3 + $0xf0] sm:$0xff]  ;;  %v754_v14 = vld [vmem:[%s2455_s3 + $0x58] sm:$0xff] }
  0x2d   : > { %1543 = vmatprep.subr.mxu1 %v343_v28  ;;  %1509 = vmatpush3.msra.mxu0 %v1269_v27  ;;  %v753_v17 = vld [vmem:[%s2455_s3 + $0x50] sm:$0xff]  ;;  %v752_v18 = vld [vmem:[%s2455_s3 + $0x48] sm:$0xff]  ;;  %v1312_v19 = vld [vmem:[%s2455_s3 + $0xd8] sm:$0xff] }
  0x2e   : > { %1544 = vmatpush3.msra.mxu1 %v343_v28  ;;  %1510 = vmatprep.subr.mxu0 %v1268_v29  ;;  %v751_v20 = vld [vmem:[%s2455_s3 + $0x40] sm:$0xff]  ;;  %v1311_v21 = vld [vmem:[%s2455_s3 + $0xd0] sm:$0xff]  ;;  %v1310_v22 = vld [vmem:[%s2455_s3 + $0xc8] sm:$0xff] }
  0x2f   : > { %1545 = vmatprep.subr.mxu1 %v342_v30  ;;  %1511 = vmatpush3.msra.mxu0 %v1268_v29  ;;  %v1309_v23 = vld [vmem:[%s2455_s3 + $0xc0] sm:$0xff]  ;;  %v1308_v24 = vld [vmem:[%s2455_s3 + $0xb8] sm:$0xff]  ;;  %v1307_v25 = vld [vmem:[%s2455_s3 + $0xb0] sm:$0xff] }
  0x30   : > { %1546 = vmatpush3.msra.mxu1 %v342_v30  ;;  %1512 = vmatprep.subr.mxu0 %v1267_v31  ;;  %v1306_v26 = vld [vmem:[%s2455_s3 + $0xa8] sm:$0xff]  ;;  %v1305_v27 = vld [vmem:[%s2455_s3 + $0xa0] sm:$0xff]  ;;  %v750_v28 = vld [vmem:[%s2455_s3 + $0x38] sm:$0xff] }
  0x31   : > { %1547 = vmatprep.subr.mxu1 %v341_v32  ;;  %1513 = vmatpush3.msra.mxu0 %v1267_v31  ;;  %v1304_v29 = vld [vmem:[%s2455_s3 + $0x98] sm:$0xff]  ;;  %v749_v30 = vld [vmem:[%s2455_s3 + $0x30] sm:$0xff] }
  0x32   : > { %1548 = vmatpush3.msra.mxu1 %v341_v32  ;;  %1514 = vmatprep.subr.mxu0 %v1266_v33  ;;  %v1303_v31 = vld [vmem:[%s2455_s3 + $0x90] sm:$0xff]  ;;  %v748_v32 = vld [vmem:[%s2455_s3 + $0x28] sm:$0xff] }
  0x33   : > { %1549 = vmatprep.subr.mxu1 %v340_v34  ;;  %1515 = vmatpush3.msra.mxu0 %v1266_v33  ;;  %v1302_v33 = vld [vmem:[%s2455_s3 + $0x88] sm:$0xff] }
  0x34   : > { %1516 = vmatprep.mubr.f32.mxu0 %v2026_v15  ;;  %1550 = vmatpush3.msra.mxu1 %v340_v34  ;;  %v747_v34 = vld [vmem:[%s2455_s3 + $0x20] sm:$0xff] }
  0x35   : > { %1551 = vmatprep.mubr.f32.mxu1 %v338_v35  ;;  %1517 = vmatmul.mubr.f32.vlgmr.msra.gmra.mxu0 %v2029_v16  ;;  %v1301_v35 = vld [vmem:[%s2455_s3 + $0x80] sm:$0xff] }
  0x36   : > { %1552 = vmatmul.mubr.f32.vlgmr.msra.gmra.mxu1 %v339_v36  ;;  %1554 = vmatprep.subr.mxu0 %v1297_v37  ;;  %v746_v36 = vld [vmem:[%s2455_s3 + $0x18] sm:$0xff] }
  0x37   : > { %1586 = vmatprep.mubr.f32.mxu0 %v525_v38  ;;  %1555 = vmatpush3.msra.mxu0 %v1297_v37  ;;  %v745_v37 = vld [vmem:[%s2455_s3 + $0x10] sm:$0xff]  ;;  %v744_v38 = vld [vmem:[%s2455_s3 + $0x8] sm:$0xff] }
  0x38   : > { %1589 = vmatprep.subr.mxu1 %v647_v39  ;;  %1556 = vmatprep.subr.mxu0 %v1296_v40 }
  0x39   : > { %1590 = vmatpush3.msra.mxu1 %v647_v39  ;;  %1557 = vmatpush3.msra.mxu0 %v1296_v40  ;;  %v743_v39 = vld [vmem:[%s2455_s3] sm:$0xff]  ;;  %v1332_v40 = vld [vmem:[%s2455_s3 + $0x178] sm:$0xff] }
  0x3a   : > { %1591 = vmatprep.subr.mxu1 %v646_v41  ;;  %1558 = vmatprep.subr.mxu0 %v1295_v42 }
  0x3b   : > { %1592 = vmatpush3.msra.mxu1 %v646_v41  ;;  %1559 = vmatpush3.msra.mxu0 %v1295_v42 }
  0x3c   : > { %1593 = vmatprep.subr.mxu1 %v645_v43  ;;  %1560 = vmatprep.subr.mxu0 %v1294_v44 }
  0x3d   : > { %1594 = vmatpush3.msra.mxu1 %v645_v43  ;;  %1561 = vmatpush3.msra.mxu0 %v1294_v44 }
  0x3e   : > { %1595 = vmatprep.subr.mxu1 %v644_v45  ;;  %1562 = vmatprep.subr.mxu0 %v1293_v46 }
  0x3f   : > { %1596 = vmatpush3.msra.mxu1 %v644_v45  ;;  %1563 = vmatpush3.msra.mxu0 %v1293_v46 }
  0x40   : > { %1597 = vmatprep.subr.mxu1 %v643_v47  ;;  %1564 = vmatprep.subr.mxu0 %v1292_v48 }
  0x41   : > { %1598 = vmatpush3.msra.mxu1 %v643_v47  ;;  %1565 = vmatpush3.msra.mxu0 %v1292_v48  ;;  %v1298_v47 = vld [vmem:[%s2454_s2] ss:$0 sm:$0xff] }
  0x42   : > { %1599 = vmatprep.subr.mxu1 %v642_v49  ;;  %1566 = vmatprep.subr.mxu0 %v1291_v50 }
  0x43   : > { %1600 = vmatpush3.msra.mxu1 %v642_v49  ;;  %1567 = vmatpush3.msra.mxu0 %v1291_v50 }
  0x44   : > { %1601 = vmatprep.subr.mxu1 %v641_v51  ;;  %1568 = vmatprep.subr.mxu0 %v1290_v52 }
  0x45   : > { %1602 = vmatpush3.msra.mxu1 %v641_v51  ;;  %1569 = vmatpush3.msra.mxu0 %v1290_v52 }
  0x46   : > { %1621 = vmatprep.mubr.f32.mxu1 %v2026_v15  ;;  %1570 = vmatprep.subr.mxu0 %v1289_v53  ;;  %v1314_v15 = vld [vmem:[%s2455_s3 + $0xe8] sm:$0xff] }
  0x47   : > { %1571 = vmatpush3.msra.mxu0 %v1289_v53  ;;  %1603 = vmatprep.subr.mxu1 %v640_v62 }
  0x48   : > { %1572 = vmatprep.subr.mxu0 %v1288_v54  ;;  %1604 = vmatpush3.msra.mxu1 %v640_v62  ;;  %v1328_v62 = vld [vmem:[%s2455_s3 + $0x158] sm:$0xff] }
  0x49   : > { %1573 = vmatpush3.msra.mxu0 %v1288_v54  ;;  %1605 = vmatprep.subr.mxu1 %v639_v63 }
  0x4a   : > { %1574 = vmatprep.subr.mxu0 %v1287_v55  ;;  %1606 = vmatpush3.msra.mxu1 %v639_v63  ;;  %v1327_v63 = vld [vmem:[%s2455_s3 + $0x150] sm:$0xff] }
  0x4b   : > { %1575 = vmatpush3.msra.mxu0 %v1287_v55  ;;  %1607 = vmatprep.subr.mxu1 %v638_v0 }
  0x4c   : > { %1576 = vmatprep.subr.mxu0 %v1286_v56  ;;  %1608 = vmatpush3.msra.mxu1 %v638_v0  ;;  %v1326_v0 = vld [vmem:[%s2455_s3 + $0x148] sm:$0xff] }
  0x4d   : > { %1577 = vmatpush3.msra.mxu0 %v1286_v56  ;;  %1609 = vmatprep.subr.mxu1 %v637_v1 }
  0x4e   : > { %1578 = vmatprep.subr.mxu0 %v1285_v57  ;;  %1610 = vmatpush3.msra.mxu1 %v637_v1  ;;  %v1325_v1 = vld [vmem:[%s2455_s3 + $0x140] sm:$0xff] }
  0x4f   : > { %1579 = vmatpush3.msra.mxu0 %v1285_v57  ;;  %1611 = vmatprep.subr.mxu1 %v636_v2 }
  0x50   : > { %1580 = vmatprep.subr.mxu0 %v1284_v58  ;;  %1612 = vmatpush3.msra.mxu1 %v636_v2  ;;  %v1324_v2 = vld [vmem:[%s2455_s3 + $0x138] sm:$0xff] }
  0x51   : > { %1581 = vmatpush3.msra.mxu0 %v1284_v58  ;;  %1613 = vmatprep.subr.mxu1 %v635_v3  ;;  %v1331_v58 = vld [vmem:[%s2455_s3 + $0x170] sm:$0xff] }
  0x52   : > { %1582 = vmatprep.subr.mxu0 %v1283_v59  ;;  %1614 = vmatpush3.msra.mxu1 %v635_v3  ;;  %v1323_v3 = vld [vmem:[%s2455_s3 + $0x130] sm:$0xff] }
  0x53   : > { %1583 = vmatpush3.msra.mxu0 %v1283_v59  ;;  %1615 = vmatprep.subr.mxu1 %v634_v5 }
  0x54   : > { %1584 = vmatprep.subr.mxu0 %v1282_v60  ;;  %1616 = vmatpush3.msra.mxu1 %v634_v5  ;;  %v1322_v5 = vld [vmem:[%s2455_s3 + $0x128] sm:$0xff] }
  0x55   : > { %1585 = vmatpush3.msra.mxu0 %v1282_v60  ;;  %1617 = vmatprep.subr.mxu1 %v633_v6  ;;  %v1330_v60 = vld [vmem:[%s2455_s3 + $0x168] sm:$0xff] }
  0x56   : > { %1587 = vmatmul.mubr.f32.vlgmr.msra.gmra.mxu0 %v526_v61  ;;  %1624 = vmatprep.subr.mxu0 %v758_v7  ;;  %v1329_v61 = vld [vmem:[%s2455_s3 + $0x160] sm:$0xff] }
  0x57   : > { %1625 = vmatpush3.msra.mxu0 %v758_v7  ;;  %1618 = vmatpush3.msra.mxu1 %v633_v6  ;;  %v1321_v6 = vld [vmem:[%s2455_s3 + $0x120] sm:$0xff]  ;;  %v1320_v7 = vld [vmem:[%s2455_s3 + $0x118] sm:$0xff] }
  0x58   : > { %1626 = vmatprep.subr.mxu0 %v757_v8  ;;  %1619 = vmatprep.subr.mxu1 %v632_v9 }
  0x59   : > { %1627 = vmatpush3.msra.mxu0 %v757_v8  ;;  %1620 = vmatpush3.msra.mxu1 %v632_v9  ;;  %v1319_v8 = vld [vmem:[%s2455_s3 + $0x110] sm:$0xff]  ;;  %v1318_v9 = vld [vmem:[%s2455_s3 + $0x108] sm:$0xff] }
  0x5a   : > { %1628 = vmatprep.subr.mxu0 %v756_v10  ;;  %1659 = vmatprep.subr.mxu1 %v1316_v11 }
  0x5b   : > { %1629 = vmatpush3.msra.mxu0 %v756_v10  ;;  %1622 = vmatmul.mubr.f32.vlgmr.msra.gmra.mxu1 %v2029_v16  ;;  %v1313_v16 = vld [vmem:[%s2455_s3 + $0xe0] sm:$0xff] }
  0x5c   : > { %1660 = vmatpush3.msra.mxu1 %v1316_v11  ;;  %1630 = vmatprep.subr.mxu0 %v755_v12  ;;  %v1317_v10 = vld [vmem:[%s2455_s3 + $0x100] sm:$0xff] }
  0x5d   : > { %1661 = vmatprep.subr.mxu1 %v1315_v13  ;;  %1631 = vmatpush3.msra.mxu0 %v755_v12 }
  0x5e   : > { %1662 = vmatpush3.msra.mxu1 %v1315_v13  ;;  %1632 = vmatprep.subr.mxu0 %v754_v14  ;;  %v1299_v13 = vld [vmem:[%s2458_s6] ss:$0 sm:$0xff] }
  0x5f   : > { %1663 = vmatprep.subr.mxu1 %v1314_v15  ;;  %1633 = vmatpush3.msra.mxu0 %v754_v14 }
  0x60   : > { %1664 = vmatpush3.msra.mxu1 %v1314_v15  ;;  %1634 = vmatprep.subr.mxu0 %v753_v17 }
  0x61   : > { %1665 = vmatprep.subr.mxu1 %v1313_v16  ;;  %1635 = vmatpush3.msra.mxu0 %v753_v17  ;;  %v1300_v17 = vld [vmem:[%s2456_s4] ss:$0 sm:$0xff] }
  0x62   : > { %1666 = vmatpush3.msra.mxu1 %v1313_v16  ;;  %1636 = vmatprep.subr.mxu0 %v752_v18 }
  0x63   : > { %1667 = vmatprep.subr.mxu1 %v1312_v19  ;;  %1637 = vmatpush3.msra.mxu0 %v752_v18 }
  0x64   : > { %1668 = vmatpush3.msra.mxu1 %v1312_v19  ;;  %1638 = vmatprep.subr.mxu0 %v751_v20 }
  0x65   : > { %1669 = vmatprep.subr.mxu1 %v1311_v21  ;;  %1639 = vmatpush3.msra.mxu0 %v751_v20 }
  0x66   : > { %1670 = vmatpush3.msra.mxu1 %v1311_v21  ;;  %1640 = vmatprep.subr.mxu0 %v750_v28 }
  0x67   : > { %1671 = vmatprep.subr.mxu1 %v1310_v22  ;;  %1641 = vmatpush3.msra.mxu0 %v750_v28 }
  0x68   : > { %1672 = vmatpush3.msra.mxu1 %v1310_v22  ;;  %1642 = vmatprep.subr.mxu0 %v749_v30 }
  0x69   : > { %1673 = vmatprep.subr.mxu1 %v1309_v23  ;;  %1643 = vmatpush3.msra.mxu0 %v749_v30 }
  0x6a   : > { %1674 = vmatpush3.msra.mxu1 %v1309_v23  ;;  %1644 = vmatprep.subr.mxu0 %v748_v32 }
  0x6b   : > { %1675 = vmatprep.subr.mxu1 %v1308_v24  ;;  %1645 = vmatpush3.msra.mxu0 %v748_v32 }
  0x6c   : > { %1676 = vmatpush3.msra.mxu1 %v1308_v24  ;;  %1646 = vmatprep.subr.mxu0 %v747_v34 }
  0x6d   : > { %1677 = vmatprep.subr.mxu1 %v1307_v25  ;;  %1647 = vmatpush3.msra.mxu0 %v747_v34  ;;  %v1119_v34 = vld [vmem:[%s2459_s7 + $0x78] sm:$0xff] }
  0x6e   : > { %1678 = vmatpush3.msra.mxu1 %v1307_v25  ;;  %1648 = vmatprep.subr.mxu0 %v746_v36 }
  0x6f   : > { %1679 = vmatprep.subr.mxu1 %v1306_v26  ;;  %1649 = vmatpush3.msra.mxu0 %v746_v36  ;;  %v1118_v36 = vld [vmem:[%s2459_s7 + $0x70] sm:$0xff] }
  0x70   : > { %1680 = vmatpush3.msra.mxu1 %v1306_v26  ;;  %1650 = vmatprep.subr.mxu0 %v745_v37 }
  0x71   : > { %1681 = vmatprep.subr.mxu1 %v1305_v27  ;;  %1651 = vmatpush3.msra.mxu0 %v745_v37  ;;  %v1117_v37 = vld [vmem:[%s2459_s7 + $0x68] sm:$0xff] }
  0x72   : > { %1682 = vmatpush3.msra.mxu1 %v1305_v27  ;;  %1652 = vmatprep.subr.mxu0 %v744_v38 }
  0x73   : > { %1683 = vmatprep.subr.mxu1 %v1304_v29  ;;  %1653 = vmatpush3.msra.mxu0 %v744_v38  ;;  %v1116_v38 = vld [vmem:[%s2459_s7 + $0x60] sm:$0xff] }
  0x74   : > { %1684 = vmatpush3.msra.mxu1 %v1304_v29  ;;  %1654 = vmatprep.subr.mxu0 %v743_v39 }
  0x75   : > { %1685 = vmatprep.subr.mxu1 %v1303_v31  ;;  %1655 = vmatpush3.msra.mxu0 %v743_v39  ;;  %v1115_v39 = vld [vmem:[%s2459_s7 + $0x58] sm:$0xff] }
  0x76   : > { %1686 = vmatpush3.msra.mxu1 %v1303_v31  ;;  %1694 = vmatprep.subr.mxu0 %v1332_v40 }
  0x77   : > { %1687 = vmatprep.subr.mxu1 %v1302_v33 }
  0x78   : > { %1688 = vmatpush3.msra.mxu1 %v1302_v33 }
  0x79   : > { %1689 = vmatprep.subr.mxu1 %v1301_v35 }
  0x7a   : > { %1690 = vmatpush3.msra.mxu1 %v1301_v35  ;;  %v1877_v35 = vmov 0.055555556  }
  0x7b   : > { %1729 = vmatprep.subr.mxu1 %v1875_v4 }
  0xf5   : > { %v1518_v41 = vpop.f32.mrf.mxu0 }
  0xf6   : > { %v1553_v42 = vpop.f32.mrf.mxu1 }
  0xf7   : > { %v441_v43 = vpop.f32.mrf.mxu0  ;;  %v522_v45 = vadd.f32 %v1553_v42, %v1518_v41  ;;  %v1113_v41 = vld [vmem:[%s2459_s7 + $0x48] sm:$0xff]  ;;  %v1112_v42 = vld [vmem:[%s2459_s7 + $0x40] sm:$0xff] }
  0xf8   : > { %v516_v44 = vpop.f32.mrf.mxu1 }
  0xf9   : > { %v517_v48 = vadd.f32 %v516_v44, %v441_v43  ;;  %v1111_v43 = vld [vmem:[%s2459_s7 + $0x38] sm:$0xff]  ;;  %v1110_v44 = vld [vmem:[%s2459_s7 + $0x30] sm:$0xff] }
 0x116   : > { %v1588_v46 = vpop.f32.mrf.mxu0 }
 0x117   : > { %v620_v49 = vadd.f32 %v1588_v46, %v522_v45  ;;  %v1109_v45 = vld [vmem:[%s2459_s7 + $0x28] sm:$0xff]  ;;  %v1108_v46 = vld [vmem:[%s2459_s7 + $0x20] sm:$0xff] }
 0x118   : > { %v610_v50 = vpop.f32.mrf.mxu0 }
 0x119   : > { %v629_v51 = vadd.f32 %v1298_v47, %v620_v49  ;;  %v619_v52 = vadd.f32 %v610_v50, %v517_v48  ;;  %v1106_v48 = vld [vmem:[%s2459_s7 + $0x10] sm:$0xff]  ;;  %v1105_v49 = vld [vmem:[%s2459_s7 + $0x8] sm:$0xff]  ;;  %v1104_v50 = vld [vmem:[%s2459_s7] sm:$0xff] }
 0x11b   : > { %v631_v53 = vmax.f32 %v629_v51, 0.0  ;;  %v628_v54 = vadd.f32 %v1298_v47, %v619_v52  ;;  %v1623_v12 = vpop.f32.mrf.mxu1  ;;  %v1107_v47 = vld [vmem:[%s2459_s7 + $0x18] sm:$0xff] }
 0x11c   : > { %v727_v14 = vadd.f32 %v1623_v12, %v1299_v13 }
 0x11d   : > { %731 = vst [vmem:[#allocation2 + $0x10] sm:$0xff] %v631_v53  ;;  %v630_v55 = vmax.f32 %v628_v54, 0.0  ;;  %v721_v15 = vpop.f32.mrf.mxu1 }
 0x11e   : > { %v722_v16 = vadd.f32 %v1299_v13, %v721_v15  ;;  %v740_v19 = vadd.f32 %v1300_v17, %v727_v14 }
 0x11f   : > { %730 = vst [vmem:[#allocation2 + $0x8] sm:$0xff] %v630_v55  ;;  %1691 = vmatprep.mubr.f32.mxu1 %v630_v55 }
 0x120   : > { %1692 = vmatmul.mubr.f32.vlgmr.msra.gmra.mxu1 %v631_v53  ;;  %v739_v20 = vadd.f32 %v1300_v17, %v722_v16  ;;  %v1120_v53 = vld [vmem:[%s2460_s8] sm:$0x1] }
 0x121   : > { %1733 = vmatprep.mubr.msk.f32.mxu1 %vm1876_vm0, %v1875_v4 }
 0x124   : > { %v933_v11 = vld [vmem:[#allocation2 + $0x11] sm:$0xff] }
 0x126   : > { %v741_v56 = vld [vmem:[#allocation2 + $0x7] sm:$0xff]  ;;  %v742_v57 = vld [vmem:[#allocation2 + $0xf] sm:$0xff] }
 0x127   : > { %1656 = vmatprep.mubr.f32.mxu0 %v741_v56  ;;  %v932_v59 = vld [vmem:[#allocation2 + $0x9] sm:$0xff] }
 0x128   : > { %1657 = vmatmul.mubr.f32.vlgmr.msra.gmra.mxu0 %v742_v57 }
 0x129   : > { %1695 = vmatpush3.msra.mxu0 %v1332_v40  ;;  %1726 = vmatprep.mubr.f32.mxu0 %v932_v59  ;;  %v1114_v40 = vld [vmem:[%s2459_s7 + $0x50] sm:$0xff] }
 0x12a   : > { %1696 = vmatprep.subr.mxu0 %v1331_v58 }
 0x12b   : > { %1697 = vmatpush3.msra.mxu0 %v1331_v58 }
 0x12c   : > { %1698 = vmatprep.subr.mxu0 %v1330_v60 }
 0x12d   : > { %1699 = vmatpush3.msra.mxu0 %v1330_v60 }
 0x12e   : > { %1700 = vmatprep.subr.mxu0 %v1329_v61 }
 0x12f   : > { %1701 = vmatpush3.msra.mxu0 %v1329_v61 }
 0x130   : > { %1702 = vmatprep.subr.mxu0 %v1328_v62 }
 0x131   : > { %1703 = vmatpush3.msra.mxu0 %v1328_v62 }
 0x132   : > { %1704 = vmatprep.subr.mxu0 %v1327_v63 }
 0x133   : > { %1705 = vmatpush3.msra.mxu0 %v1327_v63 }
 0x134   : > { %1706 = vmatprep.subr.mxu0 %v1326_v0 }
 0x135   : > { %1707 = vmatpush3.msra.mxu0 %v1326_v0 }
 0x136   : > { %1708 = vmatprep.subr.mxu0 %v1325_v1 }
 0x137   : > { %1709 = vmatpush3.msra.mxu0 %v1325_v1 }
 0x138   : > { %1710 = vmatprep.subr.mxu0 %v1324_v2 }
 0x139   : > { %1711 = vmatpush3.msra.mxu0 %v1324_v2 }
 0x13a   : > { %1712 = vmatprep.subr.mxu0 %v1323_v3 }
 0x13b   : > { %1713 = vmatpush3.msra.mxu0 %v1323_v3 }
 0x13c   : > { %1714 = vmatprep.subr.mxu0 %v1322_v5 }
 0x13d   : > { %1715 = vmatpush3.msra.mxu0 %v1322_v5 }
 0x13e   : > { %1716 = vmatprep.subr.mxu0 %v1321_v6 }
 0x13f   : > { %1717 = vmatpush3.msra.mxu0 %v1321_v6 }
 0x140   : > { %1718 = vmatprep.subr.mxu0 %v1320_v7 }
 0x141   : > { %1719 = vmatpush3.msra.mxu0 %v1320_v7 }
 0x142   : > { %1720 = vmatprep.subr.mxu0 %v1319_v8 }
 0x143   : > { %1721 = vmatpush3.msra.mxu0 %v1319_v8 }
 0x144   : > { %1722 = vmatprep.subr.mxu0 %v1318_v9 }
 0x145   : > { %1723 = vmatpush3.msra.mxu0 %v1318_v9 }
 0x146   : > { %1724 = vmatprep.subr.mxu0 %v1317_v10 }
 0x147   : > { %1725 = vmatpush3.msra.mxu0 %v1317_v10 }
 0x148   : > { %1727 = vmatmul.mubr.f32.vlgmr.msra.gmra.mxu0 %v933_v11 }
 0x1e0   : > { %v1693_v23 = vpop.f32.mrf.mxu1 }
 0x1e2   : > { %v921_v26 = vpop.f32.mrf.mxu1 }
 0x1e8   : > { %v1658_v18 = vpop.f32.mrf.mxu0 }
 0x1e9   : > { %v835_v22 = vadd.f32 %v1658_v18, %v740_v19 }
 0x1ea   : > { %v825_v21 = vpop.f32.mrf.mxu0 }
 0x1eb   : > { %v834_v24 = vadd.f32 %v825_v21, %v739_v20  ;;  %v931_v25 = vadd.f32 %v1693_v23, %v835_v22 }
 0x1ed   : > { %v930_v28 = vadd.f32 %v921_v26, %v834_v24 }
 0x208   : > { %v1728_v27 = vpop.f32.mrf.mxu0 }
 0x209   : > { %v1027_v29 = vadd.f32 %v1728_v27, %v931_v25 }
 0x20a   : > { %v1017_v30 = vpop.f32.mrf.mxu0 }
 0x20b   : > { %v1029_v31 = vmax.f32 %v1027_v29, 0.0  ;;  %v1026_v32 = vadd.f32 %v1017_v30, %v930_v28 }
 0x20d   : > { %v1028_v33 = vmax.f32 %v1026_v32, 0.0  ;;  %1730 = vmatpush3.msra.mxu1 %v1029_v31 }
 0x20e   : > { %1731 = vmatprep.subr.mxu1 %v1875_v4 }
 0x20f   : > { %1732 = vmatpush3.msra.mxu1 %v1028_v33 }
 0x210   : > { %1734 = vmatmul.mubr.msk.f32.vlgmr.msra.gmra.mxu1 %vm1030_vm1, %v1877_v35  ;;  %1736 = vmatprep.subr.mxu1 %v1875_v4 }
 0x211   : > { %1737 = vmatpush3.msra.mxu1 %v1119_v34  ;;  %1768 = vmatprep.mubr.msk.f32.mxu1 %vm1876_vm0, %v1875_v4 }
 0x212   : > { %1738 = vmatprep.subr.mxu1 %v1875_v4 }
 0x213   : > { %1739 = vmatpush3.msra.mxu1 %v1118_v36 }
 0x214   : > { %1740 = vmatprep.subr.mxu1 %v1875_v4 }
 0x215   : > { %1741 = vmatpush3.msra.mxu1 %v1117_v37 }
 0x216   : > { %1742 = vmatprep.subr.mxu1 %v1875_v4 }
 0x217   : > { %1743 = vmatpush3.msra.mxu1 %v1116_v38 }
 0x218   : > { %1744 = vmatprep.subr.mxu1 %v1875_v4 }
 0x219   : > { %1745 = vmatpush3.msra.mxu1 %v1115_v39 }
 0x21a   : > { %1746 = vmatprep.subr.mxu1 %v1875_v4 }
 0x21b   : > { %1747 = vmatpush3.msra.mxu1 %v1114_v40 }
 0x21c   : > { %1748 = vmatprep.subr.mxu1 %v1875_v4 }
 0x21d   : > { %1749 = vmatpush3.msra.mxu1 %v1113_v41 }
 0x21e   : > { %1750 = vmatprep.subr.mxu1 %v1875_v4 }
 0x21f   : > { %1751 = vmatpush3.msra.mxu1 %v1112_v42 }
 0x220   : > { %1752 = vmatprep.subr.mxu1 %v1875_v4 }
 0x221   : > { %1753 = vmatpush3.msra.mxu1 %v1111_v43 }
 0x222   : > { %1754 = vmatprep.subr.mxu1 %v1875_v4 }
 0x223   : > { %1755 = vmatpush3.msra.mxu1 %v1110_v44 }
 0x224   : > { %1756 = vmatprep.subr.mxu1 %v1875_v4 }
 0x225   : > { %1757 = vmatpush3.msra.mxu1 %v1109_v45 }
 0x226   : > { %1758 = vmatprep.subr.mxu1 %v1875_v4 }
 0x227   : > { %1759 = vmatpush3.msra.mxu1 %v1108_v46 }
 0x228   : > { %1760 = vmatprep.subr.mxu1 %v1875_v4 }
 0x229   : > { %1761 = vmatpush3.msra.mxu1 %v1107_v47 }
 0x22a   : > { %1762 = vmatprep.subr.mxu1 %v1875_v4 }
 0x22b   : > { %1763 = vmatpush3.msra.mxu1 %v1106_v48 }
 0x22c   : > { %1764 = vmatprep.subr.mxu1 %v1875_v4 }
 0x22d   : > { %1765 = vmatpush3.msra.mxu1 %v1105_v49 }
 0x22e   : > { %1766 = vmatprep.subr.mxu1 %v1875_v4 }
 0x22f   : > { %1767 = vmatpush3.msra.mxu1 %v1104_v50 }
 0x2d0   : > { %v1100_v51 = vpop.f32.mrf.mxu1 }
 0x2d1   : > { %1769 = vmatmul.mubr.f32.vlgmr.msra.gmra.mxu1 %v1100_v51 }
 0x2d2   : > { %v1735_v52 = vpop.f32.mrf.mxu1 }
 0x391   : > { %v1187_v54 = vpop.f32.mrf.mxu1 }
 0x392   : > { %v1188_v55 = vadd.f32 %v1187_v54, %v1120_v53 }
 0x393   : > { %v1770_v4 = vpop.f32.mrf.mxu1 }
 0x394   : > { %1191 = vst [vmem:[%s324_s29] sm:$0x1] %v1188_v55 }
 0x395   : > { %1826 = shalt.err (!%p1823_p3)
}
 0x396   : > { %s1827_s27 = scalar_lea.hbm %s2417_s17, 16  ;;  %s1831_s29 = scalar_lea.hbm %s2461_s9, 32 }
 0x397   : > { %p1828_p4 = scmp.ne.s32.totalorder %s2417_s17, %s1827_s27  ;;  %p1832_p9 = scmp.lt.s32.totalorder %s2417_s17, %s2461_s9 }
 0x398   : > { %p1833_p10 = scmp.lt.s32.totalorder %s1831_s29, %s1827_s27 }
 0x399   : > { %p1829_p7 = pnand %p1828_p4, %p1967_p5 }
 0x39a   : > { %p1834_p11 = por %p1833_p10, %p1832_p9 }
 0x39b   : > { %p1830_p8 = pneg %p1829_p7 }
 0x39d   : > { %p1835_p12 = pnand %p1834_p11, %p1830_p8 }
 0x39f   : > { %1838 = shalt.err (!%p1835_p12)
}
 0x3a0   : > { %1771 = dma.vmem_to_hbm [thread:$0]  (%p1967_p5), %s1206_s26, 16, %s2417_s17, %s1193_s21  }
 0x3a1 PF: > { %p1777_p13 = scmp.ge.s32.totalorder %s1873_s12, 2  ;;  %s1217_s23 = sand.u32 1, %s1861_s30  }
 0x3a2   : > { %s1218_s24 = scalar_lea.sflag [#allocation4], %s1217_s23 }
 0x3a3   : > { %p1774_p0 = pnand %p1777_p13, %p1971_p6 }
 0x3a5   : > { %p1775_p1 = pneg %p1774_p0 }
 0x3a7   : > { %1856 = dma.done.wait (%p1775_p1), %s1218_s24, 16  }
 0x3a8   : > { %1858 = vsyncadd (%p1775_p1), %s1218_s24, 4294967280  ;;  %p19_p2 = scmp.ge.s32.totalorder %s1954_s15, 4   ;;  %s2464_s30 = smov %s1865_s10 }
 0x3a9   : > { %s2465_s10 = smov %s1869_s11  ;;  %s2466_s11 = smov %s1965_s18 }
 0x3aa   : > { %s2467_s12 = smov %s1954_s15  ;;  %21 = sbr.rel (!%p19_p2) target bundleno = 3 (0x3), region = 95 }
 0x3af   :  { %1222 = vsyncpa [#allocation4], 1 }
 0x3b0   :  { %1224 = vsyncpa [#allocation4 + $0x1], 1 }

</bundles_post_ra>
